<compile_context>
chip_gen: v5e
topology: v5e:2x2
jax: 0.10.0
libtpu: 0.0.40
codegen_flags: <defaults>
</compile_context>

<pallas_src>
import functools
import math

import jax
import jax.numpy as jnp
from jax.experimental import pallas as pl
from jax.experimental.pallas import tpu as pltpu


# ---------------------------------------------------------------------------
# Pallas kernel: one (batch, spatial-tile) grid step.
#   x_ref : (K, RW)      bf16  im2col patches; K = ks*ks*Cin on sublanes,
#                              RW flattened output pixels on lanes.
#   w_ref : (Cout, K)    bf16  fused LF+HF effective kernel (resident).
#   b_ref : (Cout, 1)    f32   fused bias (zeros when the module has no bias).
#   o_ref : (2, OS, RW)        output tile, branch-major (LF rows then HF).
# ---------------------------------------------------------------------------
def _conv_mm_kernel(x_ref, w_ref, b_ref, o_ref, *, n_branch, OS):
    # Single folded-K matmul (K = ks*ks*Cin) on the MXU, f32 accumulation.
    acc = jnp.dot(w_ref[...], x_ref[...], preferred_element_type=jnp.float32)
    acc = acc + b_ref[...]                              # fused bias add (f32)
    # (Cout, RW) -> (n_branch, OS, RW): leading-sublane split, free when
    # OS % 8 == 0 (it is for this module's demo sizes).
    o_ref[...] = acc.reshape(n_branch, OS, -1).astype(o_ref.dtype)


def _round_up(a, m):
    return -(-a // m) * m


def _vmem_capacity_bytes():
    # v5e/v6e: 128 MiB, v7x: 64 MiB per TensorCore.  Guarded so a failed query
    # can never break the kernel.
    try:
        return int(pltpu.get_tpu_info().vmem_capacity_bytes)
    except Exception:
        return 64 * 1024 * 1024


def pallas_conv_im2col(x_col, w_flat, bias_col, *, out_dtype, n_branch=2):
    """x_col: (B, K, L) bf16, w_flat: (Cout, K) bf16, bias_col: (Cout, 1) f32.

    Returns (n_branch, B, Cout // n_branch, L) in out_dtype; the Cout axis is
    ordered (branch, out_channel, scale) to match the module's epilogue.
    """
    B, K, L = x_col.shape
    Cout, K_w = w_flat.shape
    assert K_w == K and Cout % n_branch == 0
    OS = Cout // n_branch

    # --- spatial tile size ---------------------------------------------------
    # Whole image in one block when it fits; otherwise big 128-lane-aligned
    # tiles.  RW_MAX keeps the (Cout, RW) f32 matmul result around <= 32 vregs
    # (no spills); per-step VMEM (double-buffered in/out blocks + weights)
    # stays well under 1 MiB, far below even v7x's 64 MiB.
    RW_MAX = 1024
    min_tiles = 2 if B == 1 else 1   # v7x megacore: give core 1 work when B == 1
    if L <= RW_MAX and min_tiles == 1:
        RW = L                       # block == full dim: no 128-pad, no slice-off
    else:
        RW = min(RW_MAX, max(128, _round_up(-(-L // min_tiles), 128)))
    n_t = -(-L // RW)
    L_pad = n_t * RW
    if L_pad != L:
        x_col = jnp.pad(x_col, ((0, 0), (0, 0), (0, L_pad - L)))

    out_bytes = n_branch * B * OS * L_pad * jnp.dtype(out_dtype).itemsize
    cost = pl.CostEstimate(
        flops=2 * B * L_pad * K * Cout,
        transcendentals=0,
        bytes_accessed=(x_col.size * 2 + w_flat.size * 2
                        + bias_col.size * 4 + out_bytes))

    y = pl.pallas_call(
        functools.partial(_conv_mm_kernel, n_branch=n_branch, OS=OS),
        out_shape=jax.ShapeDtypeStruct((n_branch, B, OS, L_pad), out_dtype),
        grid=(B, n_t),
        in_specs=[
            # im2col patches: batch dim squeezed, (K, RW) tile in VMEM.
            pl.BlockSpec((pl.Squeezed(), K, RW), lambda b, t: (b, 0, t)),
            # Fused LF+HF effective kernel: resident (constant index map).
            pl.BlockSpec((Cout, K), lambda b, t: (0, 0)),
            # Fused bias: resident.
            pl.BlockSpec((Cout, 1), lambda b, t: (0, 0)),
        ],
        out_specs=pl.BlockSpec((n_branch, pl.Squeezed(), OS, RW),
                               lambda b, t: (0, b, 0, t)),
        compiler_params=pltpu.CompilerParams(
            # No carried state across grid steps -> both axes shardable
            # (v7x megacore works even for B == 1 via the spatial axis).
            dimension_semantics=("parallel", "parallel"),
            vmem_limit_bytes=min(32 * 1024 * 1024, _vmem_capacity_bytes() // 2)),
        cost_estimate=cost,
    )(x_col, w_flat, bias_col)

    if L_pad != L:
        y = y[..., :L]
    return y


# ---------------------------------------------------------------------------
# Module forward (kernel construction + im2col + layout glue in plain JAX).
# ---------------------------------------------------------------------------
_PAD_MODE = {'circular': 'wrap', 'replicate': 'edge',
             'reflect': 'reflect', 'constant': 'constant'}


def _effective_kernel(weight, basis, *, out_channels, kernel_size):
    """weight: (O, Cin, F), basis: (ks*ks, S, F) -> (O*S, Cin, ks, ks).

    Mirrors the torch module: `weight @ basis.view(F, -1)` (row-major
    reinterpretation of the contiguous fancy-indexed basis) + view/permute.
    """
    O, Cin, F = weight.shape
    S = basis.shape[1]
    ks = kernel_size
    k = jnp.matmul(weight, basis.reshape(F, -1))             # (O, Cin, ks*ks*S)
    k = k.reshape(O, Cin, S, ks, ks)
    k = jnp.transpose(k, (0, 2, 1, 3, 4))                    # (O, S, Cin, ks, ks)
    return k.reshape(O * S, Cin, ks, ks)


def sse_conv_z2_h_forward(x, basis, even_indices, odd_indices,
                          weight_LF, weight_HF, *, out_channels, kernel_size,
                          stride=1, padding=0, padding_mode='circular',
                          bias_LF=None, bias_HF=None):
    O, ks = out_channels, kernel_size
    basis_LF = basis[:, :, even_indices]
    basis_HF = basis[:, :, odd_indices]
    S = basis_LF.shape[1]
    B, Cin, H, W = x.shape
    Cout = 2 * O * S
    K = ks * ks * Cin

    # Fused LF+HF effective kernel -> (Cout, K); K is ordered (kh, kw, cin) to
    # match the im2col patch layout built below.
    k_all = jnp.concatenate(
        [_effective_kernel(weight_LF, basis_LF, out_channels=O, kernel_size=ks),
         _effective_kernel(weight_HF, basis_HF, out_channels=O, kernel_size=ks)],
        axis=0)                                              # (Cout, Cin, ks, ks)
    w_flat = jnp.transpose(k_all, (0, 2, 3, 1)).reshape(Cout, K)
    w_flat = w_flat.astype(jnp.bfloat16)

    # Fused bias (zeros when the module has bias=False), ordered (branch, O, S).
    if bias_LF is not None:
        b2 = jnp.stack([bias_LF, bias_HF], axis=0).astype(jnp.float32)  # (2, O)
    else:
        b2 = jnp.zeros((2, O), jnp.float32)
    bias_col = jnp.broadcast_to(b2[:, :, None], (2, O, S)).reshape(Cout, 1)

    # Module padding semantics: circular pad by `padding`, then F.conv2d's
    # *additional* zero pad by `padding` (intentional duplication, matching
    # the torch code).  Everything stays NCHW -- no layout transposes.
    xp = x
    if padding > 0:
        mode = _PAD_MODE.get(padding_mode, padding_mode)
        xp = jnp.pad(xp, ((0, 0), (0, 0), (padding, padding),
                          (padding, padding)), mode=mode)
        xp = jnp.pad(xp, ((0, 0), (0, 0), (padding, padding),
                          (padding, padding)))
    xp = xp.astype(jnp.bfloat16)
    Hp, Wp = xp.shape[2], xp.shape[3]
    Ho = (Hp - ks) // stride + 1
    Wo = (Wp - ks) // stride + 1

    # im2col with stride folded in: K = ks*ks*Cin patch channels on sublanes,
    # flattened output pixels on lanes.  The ks*ks = 9x input blow-up is
    # comparable to the Cout = 2*O*S output size for this module.
    # TODO(synk): for very large images, gate this on size and fall back to an
    # in-kernel halo-DMA formulation instead of materializing 9x patches.
    taps = []
    for kh in range(ks):
        for kw in range(ks):
            taps.append(jax.lax.slice(
                xp, (0, 0, kh, kw),
                (B, Cin, kh + stride * (Ho - 1) + 1, kw + stride * (Wo - 1) + 1),
                (1, 1, stride, stride)))                     # (B, Cin, Ho, Wo)
    x_col = jnp.stack(taps, axis=1)                          # (B, ks*ks, Cin, Ho, Wo)
    x_col = x_col.reshape(B, K, Ho * Wo)

    y = pallas_conv_im2col(x_col, w_flat, bias_col, out_dtype=x.dtype)
    # (2, B, O*S, Ho*Wo) -> module layout concat([LF, HF], dim=0):
    # pure reshapes, no transposes, no extra HBM pass.
    y = y.reshape(2, B, O, S, Ho, Wo)
    return y.reshape(2 * B, O, S, Ho, Wo)


# ---------------------------------------------------------------------------
# Reference (literal per-branch translation of the torch module, lax conv).
# Conv inputs are rounded to bf16 so the numerics match the Pallas path.
# ---------------------------------------------------------------------------
def _reference_forward(x, basis, even_indices, odd_indices, weight_LF, weight_HF,
                       *, out_channels, kernel_size, stride=1, padding=0,
                       padding_mode='circular', bias_LF=None, bias_HF=None):
    O, ks = out_channels, kernel_size

    def branch(basis_b, weight_b, bias_b):
        S = basis_b.shape[1]
        k = _effective_kernel(weight_b, basis_b, out_channels=O, kernel_size=ks)
        xp = x
        if padding > 0:
            mode = _PAD_MODE.get(padding_mode, padding_mode)
            xp = jnp.pad(xp, ((0, 0), (0, 0), (padding, padding),
                              (padding, padding)), mode=mode)
            xp = jnp.pad(xp, ((0, 0), (0, 0), (padding, padding),
                              (padding, padding)))
        xp = xp.astype(jnp.bfloat16).astype(jnp.float32)
        k = k.astype(jnp.bfloat16).astype(jnp.float32)
        y = jax.lax.conv_general_dilated(
            xp, k, (stride, stride), 'VALID',
            dimension_numbers=('NCHW', 'OIHW', 'NCHW'))
        B, _, Ho, Wo = y.shape
        y = y.reshape(B, O, S, Ho, Wo)
        if bias_b is not None:
            y = y + bias_b.reshape(1, -1, 1, 1, 1)
        return y

    lf = branch(basis[:, :, even_indices], weight_LF, bias_LF)
    hf = branch(basis[:, :, odd_indices], weight_HF, bias_HF)
    return jnp.concatenate([lf, hf], axis=0)


# ---------------------------------------------------------------------------
# Demo / self-check
# ---------------------------------------------------------------------------
if __name__ == "__main__":
    B, Cin, H, W = 2, 4, 16, 16
    O = 8                       # out_channels
    ks = 3                      # kernel_size
    S = 2                       # num_scales
    n_funcs = 6
    even_indices = jnp.array([0, 2, 4], dtype=jnp.int32)
    odd_indices = jnp.array([1, 3, 5], dtype=jnp.int32)
    stride, padding = 1, 1

    key = jax.random.PRNGKey(0)
    kb, k_lf, k_hf, kx = jax.random.split(key, 4)

    # basis for permute=True: (kernel_size*kernel_size, num_scales, n_funcs)
    basis = jax.random.normal(kb, (ks * ks, S, n_funcs), jnp.float32)

    n_lf = even_indices.shape[0]
    n_hf = odd_indices.shape[0]
    bound_lf = 1.0 / math.sqrt(Cin * n_lf)
    bound_hf = 1.0 / math.sqrt(Cin * n_hf)
    weight_LF = jax.random.uniform(k_lf, (O, Cin, n_lf), jnp.float32,
                                   minval=-bound_lf, maxval=bound_lf)
    weight_HF = jax.random.uniform(k_hf, (O, Cin, n_hf), jnp.float32,
                                   minval=-bound_hf, maxval=bound_hf)
    x = jax.random.normal(kx, (B, Cin, H, W), jnp.float32)

    fwd = jax.jit(functools.partial(
        sse_conv_z2_h_forward, out_channels=O, kernel_size=ks,
        stride=stride, padding=padding, padding_mode='circular'))
    out = jax.block_until_ready(
        fwd(x, basis, even_indices, odd_indices, weight_LF, weight_HF))

    # Shape: concat([LF, HF], dim=0) -> (2B, O, S, H + 2*pad, W + 2*pad)
    expected_shape = (2 * B, O, S, H + 2 * padding, W + 2 * padding)
    assert out.shape == expected_shape, (out.shape, expected_shape)

    ref = _reference_forward(
        x, basis, even_indices, odd_indices, weight_LF, weight_HF,
        out_channels=O, kernel_size=ks, stride=stride, padding=padding,
        padding_mode='circular')
    max_err = float(jnp.max(jnp.abs(out - ref)))
    assert jnp.allclose(out, ref, atol=2e-2, rtol=2e-2), max_err

    # Second check: exercise the fused in-kernel bias path (module bias=True).
    kb1, kb2 = jax.random.split(jax.random.PRNGKey(1))
    bias_LF = 0.1 * jax.random.normal(kb1, (O,), jnp.float32)
    bias_HF = 0.1 * jax.random.normal(kb2, (O,), jnp.float32)
    out_b = jax.block_until_ready(
        fwd(x, basis, even_indices, odd_indices, weight_LF, weight_HF,
            bias_LF=bias_LF, bias_HF=bias_HF))
    ref_b = _reference_forward(
        x, basis, even_indices, odd_indices, weight_LF, weight_HF,
        out_channels=O, kernel_size=ks, stride=stride, padding=padding,
        padding_mode='circular', bias_LF=bias_LF, bias_HF=bias_HF)
    max_err_b = float(jnp.max(jnp.abs(out_b - ref_b)))
    assert jnp.allclose(out_b, ref_b, atol=2e-2, rtol=2e-2), max_err_b

    print("KERNEL_OK")
</pallas_src>

<mosaic_0001>
module attributes {stable_mosaic.version = 11 : i64} {
  func.func @_conv_mm_kernel(%arg0: i32, %arg1: i32, %arg2: memref<1x36x324xbf16, #tpu.memory_space<vmem>>, %arg3: memref<32x36xbf16, #tpu.memory_space<vmem>>, %arg4: memref<32x1xf32, #tpu.memory_space<vmem>>, %arg5: memref<2x1x16x324xf32, #tpu.memory_space<vmem>>) attributes {dimension_semantics = [#tpu.dimension_semantics<parallel>, #tpu.dimension_semantics<parallel>], iteration_bounds = array<i64: 2, 1>, scalar_prefetch = 0 : i64, scratch_operands = 0 : i64, tpu.core_type = #tpu.core_type<tc>, window_params = [{transform_indices = @transform_0, window_bounds = array<i64: 1, 36, 324>}, {pipeline_mode = #tpu.pipeline_mode<synchronous>, transform_indices = @transform_1, window_bounds = array<i64: 32, 36>}, {pipeline_mode = #tpu.pipeline_mode<synchronous>, transform_indices = @transform_2, window_bounds = array<i64: 32, 1>}, {transform_indices = @transform_3, window_bounds = array<i64: 2, 1, 16, 324>}]} {
    %c0 = arith.constant 0 : index
    %c0_0 = arith.constant 0 : index
    %0 = vector.load %arg3[%c0, %c0_0] : memref<32x36xbf16, #tpu.memory_space<vmem>>, vector<32x36xbf16>
    %c0_1 = arith.constant 0 : index
    %c0_2 = arith.constant 0 : index
    %c0_3 = arith.constant 0 : index
    %1 = vector.load %arg2[%c0_1, %c0_2, %c0_3] : memref<1x36x324xbf16, #tpu.memory_space<vmem>>, vector<1x36x324xbf16>
    %2 = vector.shape_cast %1 : vector<1x36x324xbf16> to vector<36x324xbf16>
    %cst = arith.constant dense<0.000000e+00> : vector<32x324xf32>
    %3 = tpu.matmul %0, %2, %cst {dimension_numbers = #tpu.dot_dimension_numbers<[1], [0], [0], [1], [0, 0, 1, 1], [], []>} : vector<32x36xbf16>, vector<36x324xbf16>, vector<32x324xf32> -> vector<32x324xf32>
    %c0_4 = arith.constant 0 : index
    %c0_5 = arith.constant 0 : index
    %4 = vector.load %arg4[%c0_4, %c0_5] : memref<32x1xf32, #tpu.memory_space<vmem>>, vector<32x1xf32>
    %5 = vector.broadcast %4 : vector<32x1xf32> to vector<32x324xf32>
    %6 = arith.addf %3, %5 : vector<32x324xf32>
    %7 = vector.shape_cast %6 : vector<32x324xf32> to vector<2x16x324xf32>
    %c0_6 = arith.constant 0 : index
    %c0_7 = arith.constant 0 : index
    %c0_8 = arith.constant 0 : index
    %c0_9 = arith.constant 0 : index
    %8 = vector.load %arg5[%c0_6, %c0_7, %c0_8, %c0_9] : memref<2x1x16x324xf32, #tpu.memory_space<vmem>>, vector<2x1x16x324xf32>
    %9 = vector.shape_cast %8 : vector<2x1x16x324xf32> to vector<2x16x324xf32>
    %10 = vector.shape_cast %7 : vector<2x16x324xf32> to vector<2x1x16x324xf32>
    tpu.vector_store %arg5[%c0_6, %c0_7, %c0_8, %c0_9], %10 {strides = array<i32>} : memref<2x1x16x324xf32, #tpu.memory_space<vmem>>, vector<2x1x16x324xf32>,
    return
  }
  func.func @transform_0(%arg0: i32, %arg1: i32) -> (i32, i32, i32) {
    %c0_i32 = arith.constant 0 : i32
    %c0_i32_0 = arith.constant 0 : i32
    return %arg0, %c0_i32, %arg1 : i32, i32, i32
  }
  func.func @transform_1(%arg0: i32, %arg1: i32) -> (i32, i32) {
    %c0_i32 = arith.constant 0 : i32
    %c0_i32_0 = arith.constant 0 : i32
    %c0_i32_1 = arith.constant 0 : i32
    return %c0_i32, %c0_i32_0 : i32, i32
  }
  func.func @transform_2(%arg0: i32, %arg1: i32) -> (i32, i32) {
    %c0_i32 = arith.constant 0 : i32
    %c0_i32_0 = arith.constant 0 : i32
    %c0_i32_1 = arith.constant 0 : i32
    return %c0_i32, %c0_i32_0 : i32, i32
  }
  func.func @transform_3(%arg0: i32, %arg1: i32) -> (i32, i32, i32, i32) {
    %c0_i32 = arith.constant 0 : i32
    %c0_i32_0 = arith.constant 0 : i32
    %c0_i32_1 = arith.constant 0 : i32
    return %c0_i32, %arg0, %c0_i32_0, %arg1 : i32, i32, i32, i32
  }
}

</mosaic_0001>

<bundles_post_ra>
// kernel: sse_conv_z2_h_forward.1
= control target key start
LH: loop header
LB: loop body
LE: loop exit
PB: predicated region body
PF: predicated region fallthrough
CT: control target
= control target key end

     0   :  { %s656_s12 = smov 0   ;;  %s658_s13 = smov 0   ;;  %s790_s0 = inlined_call_operand.vmem [shape: bf16[2,36,324], index: 0, kind: input, shape index: {}]   ;;  %s791_s1 = inlined_call_operand.vmem [shape: bf16[32,36], index: 1, kind: input, shape index: {}]   ;;  %s792_s2 = inlined_call_operand.vmem [shape: f32[32,1], index: 2, kind: input, shape index: {}]   ;;  %s793_s3 = inlined_call_operand.vmem [shape: f32[2,2,16,324], index: 3, kind: output, shape index: {}]  }
   0x1   :  { %s660_s14 = smov 0   ;;  %s662_s15 = smov 0  }
   0x2   :  { %s664_s16 = smov 0  }
   0x3 LB: > { %s491_s17 = sadd.s32 4294967295, %s633_s16   ;;  %s25_s18 = sadd.s32 1, %s629_s15  ;;  %s633_s16 = sphi %s664_s16, %s13_s16   ;;  %s629_s15 = sphi %s662_s15, %s798_s15   ;;  %s625_s14 = sphi %s660_s14, %s797_s14   ;;  %s621_s13 = sphi %s658_s13, %s796_s13   ;;  %s617_s12 = sphi %s656_s12, %s795_s12  }
   0x4   : > { %p27_p0 = scmp.ge.s32.totalorder %s25_s18, 2  ;;  %s104_s19 = sadd.s32 1, %s621_s13 }
   0x5   : > { %p114_p1 = scmp.ne.s32.totalorder %s621_s13, %s617_s12  ;;  %p115_p2 = scmp.eq.s32.totalorder %s491_s17, 1 }
   0x6   : > { %s800_s18 = smov (%p27_p0, %s25_s18), 0  ;;  %p495_p4 = scmp.ge.s32.totalorder %s633_s16, 1 }
   0x7   : > { %p688_p3 = por %p115_p2, %p114_p1  ;;  %s99_s21 = ssub.s32 %s629_s15, %s800_s18 }
   0x8   : > { %p158_p5 = scmp.lt.s32.totalorder %s633_s16, 3  ;;  %p102_p6 = scmp.eq.s32.totalorder %s99_s21, 0 }
   0xa   : > { %p159_p7 = pnand %p495_p4, %p158_p5 }
   0xb   : > { %s697_s22 = scalar_select %p102_p6, %s621_s13, %s104_s19  }
   0xc   : > { %162 = sbr.rel (%p159_p7) target bundleno = 206 (0xce), region = 32  ;;  %p186_p8 = scmp.lt.s32.totalorder (!%p159_p7), %s625_s14, 1 }
   0xd   : > { %s182_s19 = sand.u32 (!%p159_p7), 1, %s617_s12  }
   0xe   : > { %s549_s21 = smul.u32 (!%p159_p7), 96, %s182_s19 }
  0x10   : > { %s739_s23 = scalar_lea.vmem (!%p159_p7), [#allocation2], %s549_s21 }
  0x11   : > { %v635_v0 = vmov 0   ;;  %v211_v1 = vld [vmem:[%s792_s2] sm:$0xff]  ;;  %s187_s25 = scalar_select %p186_p8, %s625_s14, 1  ;;  %vm292_vm0 = vcmask 1041408   ;;  %v212_v16 = vld [vmem:[%s792_s2 + $0x8] sm:$0xff]  ;;  %v213_v20 = vld [vmem:[%s792_s2 + $0x10] sm:$0xff] }
  0x12   : > { %593 = vset.pattern.permute.xlu0 %v635_v0  ;;  %594 = vset.pattern.permute.xlu1 %v635_v0  ;;  %v538_v33 = vld [vmem:[%s791_s1] sm:$0xff]  ;;  %v214_v34 = vld [vmem:[%s792_s2 + $0x18] sm:$0xff]  ;;  %vm285_vm1 = vcmask 293888   ;;  %v539_v35 = vld [vmem:[%s791_s1 + $0x8] sm:$0xff]  ;;  %vm361_vm2 = vcmask 556032   ;;  %s551_s12 = smul.u32 (%p688_p3), 48, %s625_s14 }
  0x13   : > { %217 = vperm.xlu0 %593, %v211_v1   ;;  %s550_s26 = smul.u32 60, %s187_s25  ;;  %227 = vperm.xlu1 %594, %v213_v20  }
  0x15   : > { %s707_s29 = scalar_lea.vmem %s790_s0, %s550_s26  ;;  %s383_s26 = scalar_lea.vmem (%p688_p3), %s793_s3, %s551_s12 }
  0x16   : > { %v209_v2 = vld [vmem:[%s707_s29 + $0x30] sm:$0x33]  ;;  %v210_v3 = vld [vmem:[%s707_s29 + $0x38] sm:$0x3]  ;;  %v543_v7 = vld [vmem:[%s707_s29 + $0x1c] sm:$0xf] }
  0x17   : > { %v268_v4 = vunpack.c.h.b16 %v209_v2  ;;  %v269_v5 = vunpack.c.l.b16 %v210_v3  ;;  %v267_v6 = vunpack.c.l.b16 %v209_v2  ;;  %v521_v10 = vld [vmem:[%s707_s29 + $0x24] sm:$0xf0]  ;;  %v527_v11 = vld [vmem:[%s707_s29 + $0x20] sm:$0xf]  ;;  %v545_v12 = vld [vmem:[%s707_s29 + $0x28] sm:$0xf0] }
  0x18   : > { %v519_v14 = vld [vmem:[%s707_s29 + $0x18] sm:$0xf]  ;;  %v544_v15 = vld [vmem:[%s707_s29 + $0x20] sm:$0xf0]  ;;  %v524_v21 = vor.u32 %v543_v7, %v521_v10  ;;  %v528_v22 = vor.u32 %v545_v12, %v527_v11  ;;  %v509_v24 = vld [vmem:[%s707_s29 + $0xc] sm:$0xf0] }
  0x19   : > { %v277_v8 = vpack.c.b16 %v268_v4, %v268_v4  ;;  %v278_v9 = vpack.c.b16 %v269_v5, %v269_v5  ;;  %v276_v13 = vpack.c.b16 %v267_v6, %v267_v6  ;;  %v540_v23 = vld [vmem:[%s707_s29 + $0x4] sm:$0xf]  ;;  %v515_v25 = vld [vmem:[%s707_s29 + $0x8] sm:$0xf]  ;;  %v542_v26 = vld [vmem:[%s707_s29 + $0x10] sm:$0xf0]  ;;  %v520_v27 = vor.u32 %v544_v15, %v519_v14 }
  0x1a   : > { %v507_v28 = vld [vmem:[%s707_s29] sm:$0xf]  ;;  %v541_v29 = vld [vmem:[%s707_s29 + $0x8] sm:$0xf0]  ;;  %v512_v30 = vor.u32 %v540_v23, %v509_v24  ;;  %v516_v31 = vor.u32 %v542_v26, %v515_v25 }
  0x1b   : > { %v297_v17 = vsel %vm292_vm0, %v277_v8, 0  ;;  %v300_v18 = vsel %vm292_vm0, %v278_v9, 0  ;;  %v294_v19 = vsel %vm292_vm0, %v276_v13, 0  ;;  %222 = vperm.xlu0 %593, %v212_v16   ;;  %v508_v32 = vor.u32 %v541_v29, %v507_v28  ;;  %232 = vperm.xlu1 %594, %v214_v34  }
  0x1c   : > { %326 = vmatpush.bf16.msra.mxu1 %v297_v17  ;;  %345 = vmatpush.bf16.msra.mxu2 %v300_v18 }
  0x1d   : > { %546 = vmatpush.bf16.msra.mxu3 %v294_v19  ;;  %307 = vmatpush.bf16.msra.mxu0 %v294_v19 }
  0x20   : > { %327 = vmatpush.bf16.msra.mxu1 %v524_v21  ;;  %346 = vmatpush.bf16.msra.mxu2 %v528_v22 }
  0x21   : > { %547 = vmatpush.bf16.msra.mxu3 %v520_v27  ;;  %308 = vmatpush.bf16.msra.mxu0 %v520_v27 }
  0x24   : > { %328 = vmatpush.bf16.msra.mxu1 %v512_v30  ;;  %347 = vmatpush.bf16.msra.mxu2 %v516_v31 }
  0x25   : > { %548 = vmatpush.bf16.msra.mxu3 %v508_v32  ;;  %309 = vmatpush.bf16.msra.mxu0 %v508_v32 }
  0x27   : > { %531 = vmatmul.msk.bf16.vlgmr.msra.gmra.mxu1 %vm285_vm1, %v538_v33  ;;  %533 = vmatmul.msk.bf16.vlgmr.msra.gmra.mxu2 %vm285_vm1, %v538_v33 }
  0x28   : > { %530 = vmatmul.msk.bf16.vlgmr.msra.gmra.mxu3 %vm285_vm1, %v539_v35  ;;  %529 = vmatmul.msk.bf16.vlgmr.msra.gmra.mxu0 %vm285_vm1, %v538_v33 }
  0x37   : > { %532 = vmatmul.msk.bf16.gmra.mxu1 %vm285_vm1, %v539_v35  ;;  %534 = vmatmul.msk.bf16.gmra.mxu2 %vm285_vm1, %v539_v35 }
  0x85   : > { %v218_v36 = vpop.permute.xlu0 %217  ;;  %v228_v41 = vpop.permute.xlu1 %227 }
  0x8d   : > { %v223_v43 = vpop.permute.xlu0 %222  ;;  %v233_v51 = vpop.permute.xlu1 %232 }
  0xa4   : > { %v330_v37 = vpop.f32.mrf.mxu1 }
  0xa5   : > { %v331_v38 = vadd.f32 %v330_v37, %v218_v36  ;;  %v311_v39 = vpop.f32.mrf.mxu0 }
  0xa6   : > { %v312_v40 = vadd.f32 %v311_v39, %v218_v36 }
  0xa7   : > { %360 = vst [vmem:[%s739_s23 + $0x8] sm:$0xff] %v331_v38 }
  0xa8   : > { %359 = vst [vmem:[%s739_s23] sm:$0xff] %v312_v40 }
  0xaa   : > { %v349_v42 = vpop.f32.mrf.mxu2 }
  0xab   : > { %v350_v44 = vadd.f32 %v349_v42, %v218_v36  ;;  %v316_v45 = vpop.f32.mrf.mxu3 }
  0xac   : > { %v332_v46 = vpop.f32.mrf.mxu1  ;;  %v317_v47 = vadd.f32 %v316_v45, %v228_v41 }
  0xad   : > { %362 = vst.msk [vmem:[%s739_s23 + $0x10] sm:$0xff] %vm361_vm2, %v350_v44  ;;  %v333_v48 = vadd.f32 %v332_v46, %v223_v43  ;;  %v313_v49 = vpop.f32.mrf.mxu0 }
  0xae   : > { %366 = vst [vmem:[%s739_s23 + $0x30] sm:$0xff] %v317_v47  ;;  %v314_v50 = vadd.f32 %v313_v49, %v223_v43  ;;  %v398_v1 = vld [vmem:[%s739_s23 + $0x8] sm:$0xff] (%p688_p3) }
  0xaf   : > { %364 = vst [vmem:[%s739_s23 + $0x20] sm:$0xff] %v333_v48  ;;  %v396_v0 = vld [vmem:[%s739_s23] sm:$0xff] (%p688_p3) }
  0xb0   : > { %363 = vst [vmem:[%s739_s23 + $0x18] sm:$0xff] %v314_v50 }
  0xb1   : > { %397 = vst [vmem:[%s383_s26] sm:$0xff] (%p688_p3), %v396_v0 }
  0xb2   : > { %v351_v52 = vpop.f32.mrf.mxu2  ;;  %399 = vst [vmem:[%s383_s26 + $0x8] sm:$0xff] (%p688_p3), %v398_v1 }
  0xb3   : > { %v352_v53 = vadd.f32 %v351_v52, %v223_v43  ;;  %v318_v54 = vpop.f32.mrf.mxu3 }
  0xb4   : > { %v335_v55 = vpop.f32.mrf.mxu1  ;;  %v319_v56 = vadd.f32 %v318_v54, %v233_v51  ;;  %v400_v2 = vld [vmem:[%s739_s23 + $0x10] sm:$0xff] (%p688_p3) }
  0xb5   : > { %365 = vst.msk [vmem:[%s739_s23 + $0x28] sm:$0xff] %vm361_vm2, %v352_v53  ;;  %v336_v57 = vadd.f32 %v335_v55, %v228_v41  ;;  %v408_v6 = vld [vmem:[%s739_s23 + $0x30] sm:$0xff] (%p688_p3) }
  0xb6   : > { %369 = vst [vmem:[%s739_s23 + $0x48] sm:$0xff] %v319_v56  ;;  %v404_v4 = vld [vmem:[%s739_s23 + $0x20] sm:$0xff] (%p688_p3) }
  0xb7   : > { %367 = vst [vmem:[%s739_s23 + $0x38] sm:$0xff] %v336_v57  ;;  %v402_v3 = vld [vmem:[%s739_s23 + $0x18] sm:$0xff] (%p688_p3) }
  0xb8   : > { %401 = vst [vmem:[%s383_s26 + $0x10] sm:$0xff] (%p688_p3), %v400_v2 }
  0xb9   : > { %403 = vst [vmem:[%s383_s26 + $0x18] sm:$0xff] (%p688_p3), %v402_v3 }
  0xba   : > { %v354_v58 = vpop.f32.mrf.mxu2  ;;  %405 = vst [vmem:[%s383_s26 + $0x20] sm:$0xff] (%p688_p3), %v404_v4 }
  0xbb   : > { %v355_v59 = vadd.f32 %v354_v58, %v228_v41  ;;  %409 = vst [vmem:[%s383_s26 + $0x60] sm:$0xff] (%p688_p3), %v408_v6 }
  0xbc   : > { %v337_v60 = vpop.f32.mrf.mxu1  ;;  %v406_v5 = vld [vmem:[%s739_s23 + $0x28] sm:$0xff] (%p688_p3) }
  0xbd   : > { %368 = vst.msk [vmem:[%s739_s23 + $0x40] sm:$0xff] %vm361_vm2, %v355_v59  ;;  %v338_v61 = vadd.f32 %v337_v60, %v233_v51  ;;  %v414_v9 = vld [vmem:[%s739_s23 + $0x48] sm:$0xff] (%p688_p3) }
  0xbe   : > { %v410_v7 = vld [vmem:[%s739_s23 + $0x38] sm:$0xff] (%p688_p3)  ;;  %407 = vst [vmem:[%s383_s26 + $0x28] sm:$0xff] (%p688_p3), %v406_v5 }
  0xbf   : > { %370 = vst [vmem:[%s739_s23 + $0x50] sm:$0xff] %v338_v61 }
  0xc0   : > { %411 = vst [vmem:[%s383_s26 + $0x68] sm:$0xff] (%p688_p3), %v410_v7 }
  0xc1   : > { %378 = sbr.rel (!%p688_p3) target bundleno = 206 (0xce), region = 36  ;;  %415 = vst [vmem:[%s383_s26 + $0x78] sm:$0xff] (%p688_p3), %v414_v9 }
  0xc2   : > { %v356_v62 = vpop.f32.mrf.mxu2 }
  0xc3   : > { %v357_v63 = vadd.f32 %v356_v62, %v233_v51 }
  0xc4   : > { %v412_v8 = vld [vmem:[%s739_s23 + $0x40] sm:$0xff] (%p688_p3) }
  0xc5   : > { %371 = vst.msk [vmem:[%s739_s23 + $0x58] sm:$0xff] %vm361_vm2, %v357_v63 }
  0xc6   : > { %v416_v10 = vld [vmem:[%s739_s23 + $0x50] sm:$0xff]  ;;  %413 = vst [vmem:[%s383_s26 + $0x70] sm:$0xff] %v412_v8 }
  0xc7   : > { %417 = vst [vmem:[%s383_s26 + $0x80] sm:$0xff] %v416_v10 }
  0xcc   : > { %v418_v11 = vld [vmem:[%s739_s23 + $0x58] sm:$0xff] }
  0xcd   : > { %419 = vst [vmem:[%s383_s26 + $0x88] sm:$0xff] %v418_v11 }
  0xce PF: > { %s13_s16 = sadd.s32 1, %s633_s16   ;;  %s795_s12 = smov %s621_s13 }
  0xcf   : > { %p10_p9 = scmp.ge.s32.totalorder %s13_s16, 4   ;;  %s796_s13 = smov %s697_s22 }
  0xd0   : > { %s797_s14 = smov %s629_s15  ;;  %s798_s15 = smov %s800_s18 }
  0xd1   :  { %12 = sbr.rel (!%p10_p9) target bundleno = 3 (0x3), region = 85 }

</bundles_post_ra>
